<compile_context>
chip_gen: v6e
topology: v6e:2x2x1
jax: 0.10.0
libtpu: 0.0.40
codegen_flags: <defaults>
</compile_context>

<pallas_src>
import jax
import jax.numpy as jnp
from jax.experimental import pallas as pl
from jax.experimental.pallas import tpu as pltpu


def _round_up(n, m):
    return ((n + m - 1) // m) * m


def _pick_batch_tile(B, block_b):
    """Batch tile: multiple of 128, <= lane-aligned batch, >= 2 grid steps when possible."""
    Bp = _round_up(max(int(B), 1), 128)          # lane-aligned batch extent
    tb = min(int(block_b), Bp)
    if Bp >= 256:
        # Keep at least 2 grid steps: software pipelining on all chips and
        # megacore ("parallel") sharding across v7x's two TensorCores.
        tb = min(tb, _round_up(-(-Bp // 2), 128))
    return max(128, (tb // 128) * 128)


def mlp_kernel(xT_ref, w1_ref, b1_ref, w2_ref, b2_ref, o_ref):
    # x^T tile: features on sublanes, batch on lanes (lane-dense loads/stores).
    h = jnp.dot(w1_ref[...], xT_ref[...],
                preferred_element_type=jnp.float32)          # (8, TB), f32 accum
    h = jnp.maximum(h + b1_ref[...], 0.0)                    # bias (8,1) bcast over lanes + ReLU
    y = jnp.dot(w2_ref[...], h,
                preferred_element_type=jnp.float32)          # (2, TB)
    o_ref[...] = (y + b2_ref[...]).astype(o_ref.dtype)       # lane-dense store


def neural_network_forward_fm(xT, w1, b1, w2, b2, *, block_b=32768):
    """Feature-major fast path (no wrapper HBM copies).

    xT: (10, B)  f32 or bf16   (batch on the last axis)
    w1: (8, 10), b1: (8,), w2: (2, 8), b2: (2,)   (PyTorch nn.Linear layouts)
    returns y^T: (2, B) f32
    """
    in_f, B = xT.shape
    hid = w1.shape[0]
    out_f = w2.shape[0]

    TB = _pick_batch_tile(B, block_b)
    grid = (pl.cdiv(B, TB),)      # ragged last block is masked by Pallas

    w1 = w1.astype(xT.dtype)                       # layer-1 matmul in input dtype (bf16 -> native MXU)
    w2 = w2.astype(jnp.float32)                    # post-ReLU math stays f32
    b1c = b1.astype(jnp.float32).reshape(hid, 1)   # (8, 1)
    b2c = b2.astype(jnp.float32).reshape(out_f, 1) # (2, 1)

    return pl.pallas_call(
        mlp_kernel,
        out_shape=jax.ShapeDtypeStruct((out_f, B), jnp.float32),
        grid_spec=pltpu.PrefetchScalarGridSpec(
            num_scalar_prefetch=0,
            grid=grid,
            in_specs=[
                pl.BlockSpec((in_f, TB), lambda i: (0, i)),    # x^T tile, streamed over batch
                pl.BlockSpec((hid, in_f), lambda i: (0, 0)),   # W1 resident in VMEM
                pl.BlockSpec((hid, 1), lambda i: (0, 0)),      # b1 resident
                pl.BlockSpec((out_f, hid), lambda i: (0, 0)),  # W2 resident
                pl.BlockSpec((out_f, 1), lambda i: (0, 0)),    # b2 resident
            ],
            out_specs=pl.BlockSpec((out_f, TB), lambda i: (0, i)),
        ),
        compiler_params=pltpu.CompilerParams(
            # Batch tiles are independent -> shard across TensorCores (v7x megacore).
            dimension_semantics=("parallel",)),
    )(xT, w1, b1c, w2, b2c)


def neural_network_forward(x, w1, b1, w2, b2, *, block_b=32768):
    """PyTorch-layout compatibility wrapper: (B, 10) -> (B, 2).

    Only does the two boundary transposes; prefer `neural_network_forward_fm`
    when the caller can produce / consume feature-major data.
    """
    outT = neural_network_forward_fm(jnp.transpose(x), w1, b1, w2, b2, block_b=block_b)
    return jnp.transpose(outT)


def init_params(key):
    # PyTorch nn.Linear shapes: fc1.weight (8,10), fc1.bias (8,), fc2.weight (2,8), fc2.bias (2,)
    k1, k2, k3, k4 = jax.random.split(key, 4)
    bound1 = 1.0 / jnp.sqrt(10.0)
    bound2 = 1.0 / jnp.sqrt(8.0)
    w1 = jax.random.uniform(k1, (8, 10), jnp.float32, -bound1, bound1)
    b1 = jax.random.uniform(k2, (8,), jnp.float32, -bound1, bound1)
    w2 = jax.random.uniform(k3, (2, 8), jnp.float32, -bound2, bound2)
    b2 = jax.random.uniform(k4, (2,), jnp.float32, -bound2, bound2)
    return w1, b1, w2, b2


def _reference(x, w1, b1, w2, b2):
    return jnp.maximum(x @ w1.T + b1, 0.0) @ w2.T + b2


if __name__ == "__main__":
    key = jax.random.PRNGKey(0)
    kx, kp, kx2 = jax.random.split(key, 3)
    w1, b1, w2, b2 = init_params(kp)

    # 1) PyTorch-layout compatibility path, small batch (single partial tile).
    B = 8
    x = jax.random.normal(kx, (B, 10), jnp.float32)
    out = jax.block_until_ready(neural_network_forward(x, w1, b1, w2, b2))
    ref = _reference(x, w1, b1, w2, b2)
    assert out.shape == (B, 2)
    assert jnp.allclose(out, ref, atol=1e-5, rtol=1e-5)

    # 2) Feature-major fast path: ragged batch, multi-step grid, no wrapper copies.
    B2 = 4500
    xT2 = jax.random.normal(kx2, (10, B2), jnp.float32)   # already feature-major
    outT2 = jax.block_until_ready(neural_network_forward_fm(xT2, w1, b1, w2, b2))
    refT2 = _reference(xT2.T, w1, b1, w2, b2).T
    assert outT2.shape == (2, B2)
    assert jnp.allclose(outT2, refT2, atol=1e-4, rtol=1e-4)

    # 3) bf16 input path (halves x HBM traffic; f32 accumulation / bias / ReLU).
    outT3 = jax.block_until_ready(
        neural_network_forward_fm(xT2.astype(jnp.bfloat16), w1, b1, w2, b2))
    assert outT3.shape == (2, B2)
    assert jnp.allclose(outT3, refT2, atol=5e-2, rtol=5e-2)

    print("KERNEL_OK")
</pallas_src>

<mosaic_0001>
module attributes {stable_mosaic.version = 11 : i64} {
  func.func @mlp_kernel(%arg0: i32, %arg1: memref<10x128xf32, #tpu.memory_space<vmem>>, %arg2: memref<8x10xf32, #tpu.memory_space<vmem>>, %arg3: memref<8x1xf32, #tpu.memory_space<vmem>>, %arg4: memref<2x8xf32, #tpu.memory_space<vmem>>, %arg5: memref<2x1xf32, #tpu.memory_space<vmem>>, %arg6: memref<2x128xf32, #tpu.memory_space<vmem>>) attributes {dimension_semantics = [#tpu.dimension_semantics<parallel>], iteration_bounds = array<i64: 1>, scalar_prefetch = 0 : i64, scratch_operands = 0 : i64, tpu.core_type = #tpu.core_type<tc>, window_params = [{transform_indices = @transform_0, window_bounds = array<i64: 10, 128>}, {pipeline_mode = #tpu.pipeline_mode<synchronous>, transform_indices = @transform_1, window_bounds = array<i64: 8, 10>}, {pipeline_mode = #tpu.pipeline_mode<synchronous>, transform_indices = @transform_2, window_bounds = array<i64: 8, 1>}, {pipeline_mode = #tpu.pipeline_mode<synchronous>, transform_indices = @transform_3, window_bounds = array<i64: 2, 8>}, {pipeline_mode = #tpu.pipeline_mode<synchronous>, transform_indices = @transform_4, window_bounds = array<i64: 2, 1>}, {transform_indices = @transform_5, window_bounds = array<i64: 2, 128>}]} {
    %c0 = arith.constant 0 : index
    %c0_0 = arith.constant 0 : index
    %0 = vector.load %arg2[%c0, %c0_0] : memref<8x10xf32, #tpu.memory_space<vmem>>, vector<8x10xf32>
    %c0_1 = arith.constant 0 : index
    %c0_2 = arith.constant 0 : index
    %1 = vector.load %arg1[%c0_1, %c0_2] : memref<10x128xf32, #tpu.memory_space<vmem>>, vector<10x128xf32>
    %cst = arith.constant dense<0.000000e+00> : vector<8x128xf32>
    %2 = tpu.matmul %0, %1, %cst {dimension_numbers = #tpu.dot_dimension_numbers<[1], [0], [0], [1], [0, 0, 1, 1], [], []>} : vector<8x10xf32>, vector<10x128xf32>, vector<8x128xf32> -> vector<8x128xf32>
    %c0_3 = arith.constant 0 : index
    %c0_4 = arith.constant 0 : index
    %3 = vector.load %arg3[%c0_3, %c0_4] : memref<8x1xf32, #tpu.memory_space<vmem>>, vector<8x1xf32>
    %4 = vector.broadcast %3 : vector<8x1xf32> to vector<8x128xf32>
    %5 = arith.addf %2, %4 : vector<8x128xf32>
    %cst_5 = arith.constant 0.000000e+00 : f32
    %6 = vector.broadcast %cst_5 : f32 to vector<8x128xf32>
    %7 = arith.maximumf %5, %6 : vector<8x128xf32>
    %c0_6 = arith.constant 0 : index
    %c0_7 = arith.constant 0 : index
    %8 = vector.load %arg4[%c0_6, %c0_7] : memref<2x8xf32, #tpu.memory_space<vmem>>, vector<2x8xf32>
    %cst_8 = arith.constant dense<0.000000e+00> : vector<2x128xf32>
    %9 = tpu.matmul %8, %7, %cst_8 {dimension_numbers = #tpu.dot_dimension_numbers<[1], [0], [0], [1], [0, 0, 1, 1], [], []>} : vector<2x8xf32>, vector<8x128xf32>, vector<2x128xf32> -> vector<2x128xf32>
    %c0_9 = arith.constant 0 : index
    %c0_10 = arith.constant 0 : index
    %10 = vector.load %arg5[%c0_9, %c0_10] : memref<2x1xf32, #tpu.memory_space<vmem>>, vector<2x1xf32>
    %11 = vector.broadcast %10 : vector<2x1xf32> to vector<2x128xf32>
    %12 = arith.addf %9, %11 : vector<2x128xf32>
    %c0_11 = arith.constant 0 : index
    %c0_12 = arith.constant 0 : index
    %13 = vector.load %arg6[%c0_11, %c0_12] : memref<2x128xf32, #tpu.memory_space<vmem>>, vector<2x128xf32>
    tpu.vector_store %arg6[%c0_11, %c0_12], %12 {strides = array<i32>} : memref<2x128xf32, #tpu.memory_space<vmem>>, vector<2x128xf32>,
    return
  }
  func.func @transform_0(%arg0: i32) -> (i32, i32) {
    %c0_i32 = arith.constant 0 : i32
    %c0_i32_0 = arith.constant 0 : i32
    return %c0_i32, %arg0 : i32, i32
  }
  func.func @transform_1(%arg0: i32) -> (i32, i32) {
    %c0_i32 = arith.constant 0 : i32
    %c0_i32_0 = arith.constant 0 : i32
    %c0_i32_1 = arith.constant 0 : i32
    return %c0_i32, %c0_i32_0 : i32, i32
  }
  func.func @transform_2(%arg0: i32) -> (i32, i32) {
    %c0_i32 = arith.constant 0 : i32
    %c0_i32_0 = arith.constant 0 : i32
    %c0_i32_1 = arith.constant 0 : i32
    return %c0_i32, %c0_i32_0 : i32, i32
  }
  func.func @transform_3(%arg0: i32) -> (i32, i32) {
    %c0_i32 = arith.constant 0 : i32
    %c0_i32_0 = arith.constant 0 : i32
    %c0_i32_1 = arith.constant 0 : i32
    return %c0_i32, %c0_i32_0 : i32, i32
  }
  func.func @transform_4(%arg0: i32) -> (i32, i32) {
    %c0_i32 = arith.constant 0 : i32
    %c0_i32_0 = arith.constant 0 : i32
    %c0_i32_1 = arith.constant 0 : i32
    return %c0_i32, %c0_i32_0 : i32, i32
  }
  func.func @transform_5(%arg0: i32) -> (i32, i32) {
    %c0_i32 = arith.constant 0 : i32
    %c0_i32_0 = arith.constant 0 : i32
    return %c0_i32, %arg0 : i32, i32
  }
}

</mosaic_0001>

<bundles_post_ra>
// kernel: tpu_custom_call.1
= control target key start
LH: loop header
LB: loop body
LE: loop exit
PB: predicated region body
PF: predicated region fallthrough
CT: control target
= control target key end

     0   :  { %vm34_vm0 = vcmask 1041408   ;;  %v252_v1 = vmov 0.0   ;;  %vm253_vm1 = vmmov 0   ;;  %vm30_vm2 = vcmask 80896   ;;  %s307_s0 = inlined_call_operand.vmem [shape: f32[10,8], index: 0, kind: input, shape index: {}]   ;;  %s308_s1 = inlined_call_operand.vmem [shape: f32[8,10], index: 1, kind: input, shape index: {}]   ;;  %s309_s2 = inlined_call_operand.vmem [shape: f32[8,1], index: 2, kind: input, shape index: {}]   ;;  %s310_s3 = inlined_call_operand.vmem [shape: f32[2,8], index: 3, kind: input, shape index: {}]   ;;  %s311_s4 = inlined_call_operand.vmem [shape: f32[2,1], index: 4, kind: input, shape index: {}]   ;;  %s312_s5 = inlined_call_operand.hbm [shape: f32[2,8], index: 5, kind: output, shape index: {}]  }
   0x1   :  { %v23_v0 = vld [vmem:[%s307_s0 + $0x8] sm:$0x3]  ;;  %213 = vmatprep.subr.mxu0 %v252_v1  ;;  %v22_v2 = vld [vmem:[%s307_s0] sm:$0xff]  ;;  %217 = vmatprep.mubr.msk.f32.mxu0 %vm253_vm1, %v252_v1  ;;  %v254_v5 = vmov 0  }
   0x2   :  { %v24_v3 = vld [vmem:[%s309_s2] sm:$0xff]  ;;  %214 = vmatpush3.msk.msra.mxu0 %vm34_vm0, %v23_v0  ;;  %229 = vset.pattern.permute.xlu0 %v254_v5 }
   0x3   :  { %v21_v4 = vld [vmem:[%s308_s1] sm:$0xff] }
   0x4   :  { %10 = vsyncpa [#allocation3], 0  ;;  %215 = vmatprep.subr.mxu0 %v252_v1  ;;  %27 = vperm.xlu0 %229, %v24_v3   ;;  %v110_v6 = vld [vmem:[%s311_s4] sm:$0x3]  ;;  %vm116_vm3 = vcmask 64512   ;;  %s255_s27 = smov [#allocation2]  }
   0x5   :  { %216 = vmatpush3.msra.mxu0 %v22_v2  ;;  %220 = vmatprep.subr.mxu1 %v252_v1  ;;  %v109_v12 = vld [vmem:[%s310_s3] sm:$0x3]  ;;  %s197_s28 = sshll.u32 %s255_s27, 4  ;;  %s198_s28 = int_to_ptr.vmem [resolvable:$true] %s197_s28 }
   0x6   :  { %218 = vmatmul.mubr.msk.f32.vlgmr.msra.gmra.mxu0 %vm30_vm2, %v21_v4  ;;  %222 = vmatprep.mubr.msk.f32.mxu1 %vm253_vm1, %v252_v1  ;;  %s230_s4 = scalar_lea.vmem %s198_s28, 32  ;;  %p235_p1 = scmp.lt.s32.totalorder %s198_s28, %s198_s28 }
   0x7   :  { %p231_p0 = scmp.ne.s32.totalorder %s198_s28, %s230_s4  ;;  %p236_p2 = scmp.lt.s32.totalorder %s230_s4, %s230_s4 }
   0x8   :  { %113 = vperm.xlu0 %229, %v110_v6  }
   0x9   :  { %p237_p3 = por %p236_p2, %p235_p1 }
   0xb   :  { %p238_p4 = pnand %p237_p3, %p231_p0 }
  0x7f   :  { %v28_v7 = vpop.permute.xlu0 %27 }
  0x83   :  { %v114_v13 = vpop.permute.xlu0 %113 }
  0xc6   :  { %v104_v8 = vpop.f32.mrf.mxu0 }
  0xc7   :  { %v105_v9 = vadd.f32 %v104_v8, %v28_v7 }
  0xc8   :  { %v219_v10 = vpop.f32.mrf.mxu0 }
  0xc9   :  { %v108_v11 = vmax.f32 %v105_v9, 0.0 }
  0xcb   :  { %221 = vmatpush3.msra.mxu1 %v108_v11 }
  0xcc   :  { %223 = vmatmul.mubr.msk.f32.vlgmr.msra.gmra.mxu1 %vm116_vm3, %v109_v12 }
 0x18c   :  { %v186_v14 = vpop.f32.mrf.mxu1 }
 0x18d   :  { %v187_v15 = vadd.f32 %v186_v14, %v114_v13 }
 0x18e   :  { %v224_v16 = vpop.f32.mrf.mxu1 }
 0x18f   :  { %190 = vst [vmem:[#allocation2] sm:$0x3] %v187_v15 }
 0x190   :  { %241 = shalt.err (!%p238_p4)
}
 0x191   :  { %200 = dma.vmem_to_hbm [thread:$0]  %s198_s28, 32, %s312_s5, [#allocation3]  }
 0x192   :  { %250 = dma.done.wait [#allocation3], 32  }
 0x193   :  { %251 = vsyncadd [#allocation3], 4294967264 }
 0x194   :  { %204 = vsyncpa [#allocation3], 1 }

</bundles_post_ra>
